<compile_context>
chip_gen: v6e
topology: v6e:2x2x1
jax: 0.10.0
libtpu: 0.0.40
codegen_flags: <defaults>
</compile_context>

<pallas_src>
import jax
import jax.numpy as jnp
from jax import lax
from jax.experimental import pallas as pl
from jax.experimental.pallas import tpu as pltpu  # noqa: F401  (TPU backend)

# ----- model dims (small, consistent with the module) -----
B, S, D = 2, 8, 32          # batch, seq, d_model (= EncoderLayer.size)
H = 4                       # attention heads
DH = D // H                 # per-head dim
DFF = 64                    # feed-forward hidden dim
BS = B * S                  # batch-folded row count
EPS = 1e-6
NEG_BIG = 1e9


def encoder_layer_kernel(
    x_ref, bias_ref,
    ln1a_ref, ln1b_ref,
    wqkv_ref, bqkv_ref, wo_ref, bo_ref,
    ln2a_ref, ln2b_ref,
    w1_ref, b1_ref, w2_ref, b2_ref,
    out_ref,
):
    f32 = jnp.float32
    x = x_ref[...]                 # (B*S, D) — batch folded along sublanes
    bias = bias_ref[...]           # (B*S, B*S) — 0 valid, -1e9 padded / cross-batch

    def layer_norm(v, a, b):
        # PyTorch semantics: unbiased std (divide by D-1), eps added to std.
        mean = jnp.mean(v, axis=-1, keepdims=True)
        var = jnp.sum((v - mean) ** 2, axis=-1, keepdims=True) * (1.0 / (D - 1))
        inv = pl.reciprocal(jnp.sqrt(var) + EPS, approx=False)   # EUP slot
        return a * (v - mean) * inv + b

    # ---------------- sublayer 0: pre-norm + self-attention + residual ----
    xn = layer_norm(x, ln1a_ref[...], ln1b_ref[...])

    # Fused Q/K/V projection: one (B*S,D)x(D,3D) MXU matmul. Weights are already
    # (in, out) and the 1/sqrt(DH) scale is pre-folded into the Q columns/bias.
    qkv = jnp.dot(xn, wqkv_ref[...], preferred_element_type=f32) + bqkv_ref[...]

    wo_full = wo_ref[...]                       # (D, D), pre-transposed (in, out)
    # Residual + output-projection bias folded into the accumulator init.
    attn_acc = x + bo_ref[...]
    for h in range(H):                          # static unroll, H = 4 (tiny)
        lo = h * DH
        qs = qkv[:, lo:lo + DH]                 # (B*S, DH)  (scale pre-applied)
        ks = qkv[:, D + lo:D + lo + DH]         # (B*S, DH)
        vs = qkv[:, 2 * D + lo:2 * D + lo + DH] # (B*S, DH)
        # q @ k^T across the whole folded batch; cross-batch blocks are masked
        # out by the additive bias below. Contract dim 1 of both (no transpose).
        scores = lax.dot_general(qs, ks, (((1,), (1,)), ((), ())),
                                 preferred_element_type=f32)      # (B*S, B*S)
        scores = scores + bias
        m = jnp.max(scores, axis=-1, keepdims=True)
        p = jnp.exp(scores - m)
        p = p * pl.reciprocal(jnp.sum(p, axis=-1, keepdims=True), approx=True)
        ctx = jnp.dot(p, vs, preferred_element_type=f32)          # (B*S, DH)
        # Fold the output projection per head: ctx @ Wo^T[h*DH:(h+1)*DH, :].
        attn_acc = attn_acc + jnp.dot(ctx, wo_full[lo:lo + DH, :],
                                      preferred_element_type=f32)

    x1 = attn_acc                               # = x + MHA(LN1(x)) + bo

    # ---------------- sublayer 1: pre-norm + feed-forward + residual ------
    xn2 = layer_norm(x1, ln2a_ref[...], ln2b_ref[...])
    hid = jnp.dot(xn2, w1_ref[...], preferred_element_type=f32) + b1_ref[...]
    hid = jnp.maximum(hid, 0.0)
    ff = jnp.dot(hid, w2_ref[...], preferred_element_type=f32) + b2_ref[...]

    out_ref[...] = x1 + ff


def prepare_params(params):
    """One-time weight preprocessing (run once at setup, NOT per forward call).

    - transpose all weights to (in, out),
    - fuse Q/K/V into one (D, 3D) weight + (1, 3D) bias,
    - fold the 1/sqrt(DH) attention scale into the Q columns/bias.
    """
    inv_scale = 1.0 / (DH ** 0.5)
    return {
        "wqkv": jnp.concatenate(
            [params["wq"].T * inv_scale, params["wk"].T, params["wv"].T], axis=1),
        "bqkv": jnp.concatenate(
            [params["bq"] * inv_scale, params["bk"], params["bv"]], axis=1),
        "wo_t": params["wo"].T,          # (D, D)
        "bo": params["bo"],
        "w1_t": params["w1"].T,          # (D, DFF)
        "b1": params["b1"],
        "w2_t": params["w2"].T,          # (DFF, D)
        "b2": params["b2"],
        "ln1_a": params["ln1_a"], "ln1_b": params["ln1_b"],
        "ln2_a": params["ln2_a"], "ln2_b": params["ln2_b"],
    }


def encoder_layer_pallas(x, padding_mask, prep):
    # Per-call, input-dependent preprocessing only: build the combined additive
    # attention bias over the batch-folded key axis. 0 = attend; -1e9 = padded
    # key or different batch element. (Cross-batch structure is shape-static
    # and constant-folded under jit.)
    key_bias = ((padding_mask - 1.0) * NEG_BIG).reshape(BS)          # (B*S,)
    bids = jnp.arange(BS, dtype=jnp.int32) // S                      # batch id / row
    cross = jnp.where(bids[:, None] == bids[None, :],
                      0.0, -NEG_BIG).astype(jnp.float32)             # (B*S, B*S)
    bias = cross + key_bias[None, :]                                 # (B*S, B*S)

    x2d = x.reshape(BS, D)

    # No grid: a single invocation; every operand is one full-array VMEM block.
    out = pl.pallas_call(
        encoder_layer_kernel,
        out_shape=jax.ShapeDtypeStruct((BS, D), x.dtype),
    )(
        x2d, bias,
        prep["ln1_a"], prep["ln1_b"],
        prep["wqkv"], prep["bqkv"], prep["wo_t"], prep["bo"],
        prep["ln2_a"], prep["ln2_b"],
        prep["w1_t"], prep["b1"], prep["w2_t"], prep["b2"],
    )
    return out.reshape(B, S, D)


# ---------------- pure-JAX reference (PyTorch math, for validation) ----------------
def encoder_layer_ref(x, mask, p):
    def layer_norm(v, a, b):
        mean = jnp.mean(v, axis=-1, keepdims=True)
        var = jnp.sum((v - mean) ** 2, axis=-1, keepdims=True) / (D - 1)
        return a * (v - mean) / (jnp.sqrt(var) + EPS) + b

    def linear(v, w, bias):
        return jnp.einsum("bsd,od->bso", v, w) + bias

    xn = layer_norm(x, p["ln1_a"], p["ln1_b"])
    q = linear(xn, p["wq"], p["bq"]).reshape(B, S, H, DH).transpose(0, 2, 1, 3)
    k = linear(xn, p["wk"], p["bk"]).reshape(B, S, H, DH).transpose(0, 2, 1, 3)
    v = linear(xn, p["wv"], p["bv"]).reshape(B, S, H, DH).transpose(0, 2, 1, 3)
    scores = jnp.einsum("bhqd,bhkd->bhqk", q, k) / jnp.sqrt(jnp.float32(DH))
    scores = jnp.where(mask[:, None, None, :] == 0, -1e9, scores)
    probs = jax.nn.softmax(scores, axis=-1)
    attn = jnp.einsum("bhqk,bhkd->bhqd", probs, v)
    attn = attn.transpose(0, 2, 1, 3).reshape(B, S, D)
    x1 = x + linear(attn, p["wo"], p["bo"])
    xn2 = layer_norm(x1, p["ln2_a"], p["ln2_b"])
    hid = jnp.maximum(jnp.einsum("bsd,fd->bsf", xn2, p["w1"]) + p["b1"], 0.0)
    ff = jnp.einsum("bsf,of->bso", hid, p["w2"]) + p["b2"]
    return x1 + ff


def init_params(key):
    ks = jax.random.split(key, 12)
    sc = 0.05
    n = lambda k, shape: (jax.random.normal(k, shape, jnp.float32) * sc)
    return {
        # LayerNorm params (PyTorch init: ones / zeros), kept 2D for TPU layout.
        "ln1_a": jnp.ones((1, D), jnp.float32),
        "ln1_b": jnp.zeros((1, D), jnp.float32),
        "ln2_a": jnp.ones((1, D), jnp.float32),
        "ln2_b": jnp.zeros((1, D), jnp.float32),
        # Attention projections, PyTorch Linear convention (out, in).
        "wq": n(ks[0], (D, D)), "bq": n(ks[1], (1, D)),
        "wk": n(ks[2], (D, D)), "bk": n(ks[3], (1, D)),
        "wv": n(ks[4], (D, D)), "bv": n(ks[5], (1, D)),
        "wo": n(ks[6], (D, D)), "bo": n(ks[7], (1, D)),
        # Positionwise feed-forward.
        "w1": n(ks[8], (DFF, D)), "b1": n(ks[9], (1, DFF)),
        "w2": n(ks[10], (D, DFF)), "b2": n(ks[11], (1, D)),
    }


if __name__ == "__main__":
    root = jax.random.PRNGKey(0)
    kx, kp = jax.random.split(root)

    x = jax.random.normal(kx, (B, S, D), jnp.float32)
    # padding mask: batch 0 fully valid, batch 1 has last 3 positions padded.
    padding_mask = jnp.array(
        [[1.0] * S, [1.0] * (S - 3) + [0.0] * 3], dtype=jnp.float32)
    params = init_params(kp)

    # One-time weight fusion/transposition, hoisted out of the per-call path.
    prep = jax.tree_util.tree_map(jax.block_until_ready, prepare_params(params))

    forward = jax.jit(encoder_layer_pallas)
    out = forward(x, padding_mask, prep)
    out = jax.block_until_ready(out)

    ref = encoder_layer_ref(x, padding_mask, params)
    assert out.shape == (B, S, D) and out.dtype == jnp.float32
    assert jnp.allclose(out, ref, atol=2e-3, rtol=2e-3), (
        float(jnp.max(jnp.abs(out - ref))))

    print("KERNEL_OK")
</pallas_src>

<mosaic_0001>
module attributes {stable_mosaic.version = 11 : i64} {
  func.func @encoder_layer_kernel(%arg0: memref<16x32xf32, #tpu.memory_space<vmem>>, %arg1: memref<16x16xf32, #tpu.memory_space<vmem>>, %arg2: memref<1x32xf32, #tpu.memory_space<vmem>>, %arg3: memref<1x32xf32, #tpu.memory_space<vmem>>, %arg4: memref<32x96xf32, #tpu.memory_space<vmem>>, %arg5: memref<1x96xf32, #tpu.memory_space<vmem>>, %arg6: memref<32x32xf32, #tpu.memory_space<vmem>>, %arg7: memref<1x32xf32, #tpu.memory_space<vmem>>, %arg8: memref<1x32xf32, #tpu.memory_space<vmem>>, %arg9: memref<1x32xf32, #tpu.memory_space<vmem>>, %arg10: memref<32x64xf32, #tpu.memory_space<vmem>>, %arg11: memref<1x64xf32, #tpu.memory_space<vmem>>, %arg12: memref<64x32xf32, #tpu.memory_space<vmem>>, %arg13: memref<1x32xf32, #tpu.memory_space<vmem>>, %arg14: memref<16x32xf32, #tpu.memory_space<vmem>>) attributes {dimension_semantics = [], scalar_prefetch = 0 : i64, scratch_operands = 0 : i64, tpu.core_type = #tpu.core_type<tc>} {
    %c0 = arith.constant 0 : index
    %c0_0 = arith.constant 0 : index
    %0 = vector.load %arg0[%c0, %c0_0] : memref<16x32xf32, #tpu.memory_space<vmem>>, vector<16x32xf32>
    %c0_1 = arith.constant 0 : index
    %c0_2 = arith.constant 0 : index
    %1 = vector.load %arg1[%c0_1, %c0_2] : memref<16x16xf32, #tpu.memory_space<vmem>>, vector<16x16xf32>
    %c0_3 = arith.constant 0 : index
    %c0_4 = arith.constant 0 : index
    %2 = vector.load %arg2[%c0_3, %c0_4] : memref<1x32xf32, #tpu.memory_space<vmem>>, vector<1x32xf32>
    %c0_5 = arith.constant 0 : index
    %c0_6 = arith.constant 0 : index
    %3 = vector.load %arg3[%c0_5, %c0_6] : memref<1x32xf32, #tpu.memory_space<vmem>>, vector<1x32xf32>
    %cst = arith.constant dense<0.000000e+00> : vector<16xf32>
    %4 = vector.multi_reduction <add>, %0, %cst [1] : vector<16x32xf32> to vector<16xf32>
    %5 = vector.shape_cast %4 : vector<16xf32> to vector<16x1xf32>
    %cst_7 = arith.constant 3.200000e+01 : f32
    %6 = vector.broadcast %cst_7 : f32 to vector<16x1xf32>
    %7 = arith.divf %5, %6 : vector<16x1xf32>
    %8 = vector.broadcast %7 : vector<16x1xf32> to vector<16x32xf32>
    %9 = arith.subf %0, %8 : vector<16x32xf32>
    %10 = arith.mulf %9, %9 : vector<16x32xf32>
    %cst_8 = arith.constant dense<0.000000e+00> : vector<16xf32>
    %11 = vector.multi_reduction <add>, %10, %cst_8 [1] : vector<16x32xf32> to vector<16xf32>
    %12 = vector.shape_cast %11 : vector<16xf32> to vector<16x1xf32>
    %cst_9 = arith.constant 0.0322580636 : f32
    %13 = vector.broadcast %cst_9 : f32 to vector<16x1xf32>
    %14 = arith.mulf %12, %13 : vector<16x1xf32>
    %15 = math.sqrt %14 : vector<16x1xf32>
    %cst_10 = arith.constant 9.99999997E-7 : f32
    %16 = vector.broadcast %cst_10 : f32 to vector<16x1xf32>
    %17 = arith.addf %15, %16 : vector<16x1xf32>
    %18 = tpu.reciprocal %17 : vector<16x1xf32> -> vector<16x1xf32>
    %19 = vector.broadcast %7 : vector<16x1xf32> to vector<16x32xf32>
    %20 = arith.subf %0, %19 : vector<16x32xf32>
    %21 = vector.broadcast %2 : vector<1x32xf32> to vector<16x32xf32>
    %22 = arith.mulf %21, %20 : vector<16x32xf32>
    %23 = vector.broadcast %18 : vector<16x1xf32> to vector<16x32xf32>
    %24 = arith.mulf %22, %23 : vector<16x32xf32>
    %25 = vector.broadcast %3 : vector<1x32xf32> to vector<16x32xf32>
    %26 = arith.addf %24, %25 : vector<16x32xf32>
    %c0_11 = arith.constant 0 : index
    %c0_12 = arith.constant 0 : index
    %27 = vector.load %arg4[%c0_11, %c0_12] : memref<32x96xf32, #tpu.memory_space<vmem>>, vector<32x96xf32>
    %cst_13 = arith.constant dense<0.000000e+00> : vector<16x96xf32>
    %28 = tpu.matmul %26, %27, %cst_13 {dimension_numbers = #tpu.dot_dimension_numbers<[1], [0], [0], [1], [0, 0, 1, 1], [], []>} : vector<16x32xf32>, vector<32x96xf32>, vector<16x96xf32> -> vector<16x96xf32>
    %c0_14 = arith.constant 0 : index
    %c0_15 = arith.constant 0 : index
    %29 = vector.load %arg5[%c0_14, %c0_15] : memref<1x96xf32, #tpu.memory_space<vmem>>, vector<1x96xf32>
    %30 = vector.broadcast %29 : vector<1x96xf32> to vector<16x96xf32>
    %31 = arith.addf %28, %30 : vector<16x96xf32>
    %c0_16 = arith.constant 0 : index
    %c0_17 = arith.constant 0 : index
    %32 = vector.load %arg6[%c0_16, %c0_17] : memref<32x32xf32, #tpu.memory_space<vmem>>, vector<32x32xf32>
    %c0_18 = arith.constant 0 : index
    %c0_19 = arith.constant 0 : index
    %33 = vector.load %arg7[%c0_18, %c0_19] : memref<1x32xf32, #tpu.memory_space<vmem>>, vector<1x32xf32>
    %34 = vector.broadcast %33 : vector<1x32xf32> to vector<16x32xf32>
    %35 = arith.addf %0, %34 : vector<16x32xf32>
    %36 = vector.extract_strided_slice %31 {offsets = [0, 0], sizes = [16, 8], strides = [1, 1]} : vector<16x96xf32> to vector<16x8xf32>
    %37 = vector.extract_strided_slice %31 {offsets = [0, 32], sizes = [16, 8], strides = [1, 1]} : vector<16x96xf32> to vector<16x8xf32>
    %38 = vector.extract_strided_slice %31 {offsets = [0, 64], sizes = [16, 8], strides = [1, 1]} : vector<16x96xf32> to vector<16x8xf32>
    %cst_20 = arith.constant dense<0.000000e+00> : vector<16x16xf32>
    %39 = tpu.matmul %36, %37, %cst_20 {dimension_numbers = #tpu.dot_dimension_numbers<[1], [1], [0], [0], [0, 0, 1, 0], [], []>} : vector<16x8xf32>, vector<16x8xf32>, vector<16x16xf32> -> vector<16x16xf32>
    %40 = arith.addf %39, %1 : vector<16x16xf32>
    %cst_21 = arith.constant dense<0xFF800000> : vector<16xf32>
    %41 = vector.multi_reduction <maximumf>, %40, %cst_21 [1] : vector<16x16xf32> to vector<16xf32>
    %42 = vector.shape_cast %41 : vector<16xf32> to vector<16x1xf32>
    %43 = vector.broadcast %42 : vector<16x1xf32> to vector<16x16xf32>
    %44 = arith.subf %40, %43 : vector<16x16xf32>
    %45 = math.exp %44 : vector<16x16xf32>
    %cst_22 = arith.constant dense<0.000000e+00> : vector<16xf32>
    %46 = vector.multi_reduction <add>, %45, %cst_22 [1] : vector<16x16xf32> to vector<16xf32>
    %47 = vector.shape_cast %46 : vector<16xf32> to vector<16x1xf32>
    %48 = tpu.reciprocal %47 {approx = true} : vector<16x1xf32> -> vector<16x1xf32>
    %49 = vector.broadcast %48 : vector<16x1xf32> to vector<16x16xf32>
    %50 = arith.mulf %45, %49 : vector<16x16xf32>
    %cst_23 = arith.constant dense<0.000000e+00> : vector<16x8xf32>
    %51 = tpu.matmul %50, %38, %cst_23 {dimension_numbers = #tpu.dot_dimension_numbers<[1], [0], [0], [1], [0, 0, 1, 1], [], []>} : vector<16x16xf32>, vector<16x8xf32>, vector<16x8xf32> -> vector<16x8xf32>
    %52 = vector.extract_strided_slice %32 {offsets = [0, 0], sizes = [8, 32], strides = [1, 1]} : vector<32x32xf32> to vector<8x32xf32>
    %cst_24 = arith.constant dense<0.000000e+00> : vector<16x32xf32>
    %53 = tpu.matmul %51, %52, %cst_24 {dimension_numbers = #tpu.dot_dimension_numbers<[1], [0], [0], [1], [0, 0, 1, 1], [], []>} : vector<16x8xf32>, vector<8x32xf32>, vector<16x32xf32> -> vector<16x32xf32>
    %54 = arith.addf %35, %53 : vector<16x32xf32>
    %55 = vector.extract_strided_slice %31 {offsets = [0, 8], sizes = [16, 8], strides = [1, 1]} : vector<16x96xf32> to vector<16x8xf32>
    %56 = vector.extract_strided_slice %31 {offsets = [0, 40], sizes = [16, 8], strides = [1, 1]} : vector<16x96xf32> to vector<16x8xf32>
    %57 = vector.extract_strided_slice %31 {offsets = [0, 72], sizes = [16, 8], strides = [1, 1]} : vector<16x96xf32> to vector<16x8xf32>
    %cst_25 = arith.constant dense<0.000000e+00> : vector<16x16xf32>
    %58 = tpu.matmul %55, %56, %cst_25 {dimension_numbers = #tpu.dot_dimension_numbers<[1], [1], [0], [0], [0, 0, 1, 0], [], []>} : vector<16x8xf32>, vector<16x8xf32>, vector<16x16xf32> -> vector<16x16xf32>
    %59 = arith.addf %58, %1 : vector<16x16xf32>
    %cst_26 = arith.constant dense<0xFF800000> : vector<16xf32>
    %60 = vector.multi_reduction <maximumf>, %59, %cst_26 [1] : vector<16x16xf32> to vector<16xf32>
    %61 = vector.shape_cast %60 : vector<16xf32> to vector<16x1xf32>
    %62 = vector.broadcast %61 : vector<16x1xf32> to vector<16x16xf32>
    %63 = arith.subf %59, %62 : vector<16x16xf32>
    %64 = math.exp %63 : vector<16x16xf32>
    %cst_27 = arith.constant dense<0.000000e+00> : vector<16xf32>
    %65 = vector.multi_reduction <add>, %64, %cst_27 [1] : vector<16x16xf32> to vector<16xf32>
    %66 = vector.shape_cast %65 : vector<16xf32> to vector<16x1xf32>
    %67 = tpu.reciprocal %66 {approx = true} : vector<16x1xf32> -> vector<16x1xf32>
    %68 = vector.broadcast %67 : vector<16x1xf32> to vector<16x16xf32>
    %69 = arith.mulf %64, %68 : vector<16x16xf32>
    %cst_28 = arith.constant dense<0.000000e+00> : vector<16x8xf32>
    %70 = tpu.matmul %69, %57, %cst_28 {dimension_numbers = #tpu.dot_dimension_numbers<[1], [0], [0], [1], [0, 0, 1, 1], [], []>} : vector<16x16xf32>, vector<16x8xf32>, vector<16x8xf32> -> vector<16x8xf32>
    %71 = vector.extract_strided_slice %32 {offsets = [8, 0], sizes = [8, 32], strides = [1, 1]} : vector<32x32xf32> to vector<8x32xf32>
    %cst_29 = arith.constant dense<0.000000e+00> : vector<16x32xf32>
    %72 = tpu.matmul %70, %71, %cst_29 {dimension_numbers = #tpu.dot_dimension_numbers<[1], [0], [0], [1], [0, 0, 1, 1], [], []>} : vector<16x8xf32>, vector<8x32xf32>, vector<16x32xf32> -> vector<16x32xf32>
    %73 = arith.addf %54, %72 : vector<16x32xf32>
    %74 = vector.extract_strided_slice %31 {offsets = [0, 16], sizes = [16, 8], strides = [1, 1]} : vector<16x96xf32> to vector<16x8xf32>
    %75 = vector.extract_strided_slice %31 {offsets = [0, 48], sizes = [16, 8], strides = [1, 1]} : vector<16x96xf32> to vector<16x8xf32>
    %76 = vector.extract_strided_slice %31 {offsets = [0, 80], sizes = [16, 8], strides = [1, 1]} : vector<16x96xf32> to vector<16x8xf32>
    %cst_30 = arith.constant dense<0.000000e+00> : vector<16x16xf32>
    %77 = tpu.matmul %74, %75, %cst_30 {dimension_numbers = #tpu.dot_dimension_numbers<[1], [1], [0], [0], [0, 0, 1, 0], [], []>} : vector<16x8xf32>, vector<16x8xf32>, vector<16x16xf32> -> vector<16x16xf32>
    %78 = arith.addf %77, %1 : vector<16x16xf32>
    %cst_31 = arith.constant dense<0xFF800000> : vector<16xf32>
    %79 = vector.multi_reduction <maximumf>, %78, %cst_31 [1] : vector<16x16xf32> to vector<16xf32>
    %80 = vector.shape_cast %79 : vector<16xf32> to vector<16x1xf32>
    %81 = vector.broadcast %80 : vector<16x1xf32> to vector<16x16xf32>
    %82 = arith.subf %78, %81 : vector<16x16xf32>
    %83 = math.exp %82 : vector<16x16xf32>
    %cst_32 = arith.constant dense<0.000000e+00> : vector<16xf32>
    %84 = vector.multi_reduction <add>, %83, %cst_32 [1] : vector<16x16xf32> to vector<16xf32>
    %85 = vector.shape_cast %84 : vector<16xf32> to vector<16x1xf32>
    %86 = tpu.reciprocal %85 {approx = true} : vector<16x1xf32> -> vector<16x1xf32>
    %87 = vector.broadcast %86 : vector<16x1xf32> to vector<16x16xf32>
    %88 = arith.mulf %83, %87 : vector<16x16xf32>
    %cst_33 = arith.constant dense<0.000000e+00> : vector<16x8xf32>
    %89 = tpu.matmul %88, %76, %cst_33 {dimension_numbers = #tpu.dot_dimension_numbers<[1], [0], [0], [1], [0, 0, 1, 1], [], []>} : vector<16x16xf32>, vector<16x8xf32>, vector<16x8xf32> -> vector<16x8xf32>
    %90 = vector.extract_strided_slice %32 {offsets = [16, 0], sizes = [8, 32], strides = [1, 1]} : vector<32x32xf32> to vector<8x32xf32>
    %cst_34 = arith.constant dense<0.000000e+00> : vector<16x32xf32>
    %91 = tpu.matmul %89, %90, %cst_34 {dimension_numbers = #tpu.dot_dimension_numbers<[1], [0], [0], [1], [0, 0, 1, 1], [], []>} : vector<16x8xf32>, vector<8x32xf32>, vector<16x32xf32> -> vector<16x32xf32>
    %92 = arith.addf %73, %91 : vector<16x32xf32>
    %93 = vector.extract_strided_slice %31 {offsets = [0, 24], sizes = [16, 8], strides = [1, 1]} : vector<16x96xf32> to vector<16x8xf32>
    %94 = vector.extract_strided_slice %31 {offsets = [0, 56], sizes = [16, 8], strides = [1, 1]} : vector<16x96xf32> to vector<16x8xf32>
    %95 = vector.extract_strided_slice %31 {offsets = [0, 88], sizes = [16, 8], strides = [1, 1]} : vector<16x96xf32> to vector<16x8xf32>
    %cst_35 = arith.constant dense<0.000000e+00> : vector<16x16xf32>
    %96 = tpu.matmul %93, %94, %cst_35 {dimension_numbers = #tpu.dot_dimension_numbers<[1], [1], [0], [0], [0, 0, 1, 0], [], []>} : vector<16x8xf32>, vector<16x8xf32>, vector<16x16xf32> -> vector<16x16xf32>
    %97 = arith.addf %96, %1 : vector<16x16xf32>
    %cst_36 = arith.constant dense<0xFF800000> : vector<16xf32>
    %98 = vector.multi_reduction <maximumf>, %97, %cst_36 [1] : vector<16x16xf32> to vector<16xf32>
    %99 = vector.shape_cast %98 : vector<16xf32> to vector<16x1xf32>
    %100 = vector.broadcast %99 : vector<16x1xf32> to vector<16x16xf32>
    %101 = arith.subf %97, %100 : vector<16x16xf32>
    %102 = math.exp %101 : vector<16x16xf32>
    %cst_37 = arith.constant dense<0.000000e+00> : vector<16xf32>
    %103 = vector.multi_reduction <add>, %102, %cst_37 [1] : vector<16x16xf32> to vector<16xf32>
    %104 = vector.shape_cast %103 : vector<16xf32> to vector<16x1xf32>
    %105 = tpu.reciprocal %104 {approx = true} : vector<16x1xf32> -> vector<16x1xf32>
    %106 = vector.broadcast %105 : vector<16x1xf32> to vector<16x16xf32>
    %107 = arith.mulf %102, %106 : vector<16x16xf32>
    %cst_38 = arith.constant dense<0.000000e+00> : vector<16x8xf32>
    %108 = tpu.matmul %107, %95, %cst_38 {dimension_numbers = #tpu.dot_dimension_numbers<[1], [0], [0], [1], [0, 0, 1, 1], [], []>} : vector<16x16xf32>, vector<16x8xf32>, vector<16x8xf32> -> vector<16x8xf32>
    %109 = vector.extract_strided_slice %32 {offsets = [24, 0], sizes = [8, 32], strides = [1, 1]} : vector<32x32xf32> to vector<8x32xf32>
    %cst_39 = arith.constant dense<0.000000e+00> : vector<16x32xf32>
    %110 = tpu.matmul %108, %109, %cst_39 {dimension_numbers = #tpu.dot_dimension_numbers<[1], [0], [0], [1], [0, 0, 1, 1], [], []>} : vector<16x8xf32>, vector<8x32xf32>, vector<16x32xf32> -> vector<16x32xf32>
    %111 = arith.addf %92, %110 : vector<16x32xf32>
    %c0_40 = arith.constant 0 : index
    %c0_41 = arith.constant 0 : index
    %112 = vector.load %arg8[%c0_40, %c0_41] : memref<1x32xf32, #tpu.memory_space<vmem>>, vector<1x32xf32>
    %c0_42 = arith.constant 0 : index
    %c0_43 = arith.constant 0 : index
    %113 = vector.load %arg9[%c0_42, %c0_43] : memref<1x32xf32, #tpu.memory_space<vmem>>, vector<1x32xf32>
    %cst_44 = arith.constant dense<0.000000e+00> : vector<16xf32>
    %114 = vector.multi_reduction <add>, %111, %cst_44 [1] : vector<16x32xf32> to vector<16xf32>
    %115 = vector.shape_cast %114 : vector<16xf32> to vector<16x1xf32>
    %cst_45 = arith.constant 3.200000e+01 : f32
    %116 = vector.broadcast %cst_45 : f32 to vector<16x1xf32>
    %117 = arith.divf %115, %116 : vector<16x1xf32>
    %118 = vector.broadcast %117 : vector<16x1xf32> to vector<16x32xf32>
    %119 = arith.subf %111, %118 : vector<16x32xf32>
    %120 = arith.mulf %119, %119 : vector<16x32xf32>
    %cst_46 = arith.constant dense<0.000000e+00> : vector<16xf32>
    %121 = vector.multi_reduction <add>, %120, %cst_46 [1] : vector<16x32xf32> to vector<16xf32>
    %122 = vector.shape_cast %121 : vector<16xf32> to vector<16x1xf32>
    %cst_47 = arith.constant 0.0322580636 : f32
    %123 = vector.broadcast %cst_47 : f32 to vector<16x1xf32>
    %124 = arith.mulf %122, %123 : vector<16x1xf32>
    %125 = math.sqrt %124 : vector<16x1xf32>
    %cst_48 = arith.constant 9.99999997E-7 : f32
    %126 = vector.broadcast %cst_48 : f32 to vector<16x1xf32>
    %127 = arith.addf %125, %126 : vector<16x1xf32>
    %128 = tpu.reciprocal %127 : vector<16x1xf32> -> vector<16x1xf32>
    %129 = vector.broadcast %117 : vector<16x1xf32> to vector<16x32xf32>
    %130 = arith.subf %111, %129 : vector<16x32xf32>
    %131 = vector.broadcast %112 : vector<1x32xf32> to vector<16x32xf32>
    %132 = arith.mulf %131, %130 : vector<16x32xf32>
    %133 = vector.broadcast %128 : vector<16x1xf32> to vector<16x32xf32>
    %134 = arith.mulf %132, %133 : vector<16x32xf32>
    %135 = vector.broadcast %113 : vector<1x32xf32> to vector<16x32xf32>
    %136 = arith.addf %134, %135 : vector<16x32xf32>
    %c0_49 = arith.constant 0 : index
    %c0_50 = arith.constant 0 : index
    %137 = vector.load %arg10[%c0_49, %c0_50] : memref<32x64xf32, #tpu.memory_space<vmem>>, vector<32x64xf32>
    %cst_51 = arith.constant dense<0.000000e+00> : vector<16x64xf32>
    %138 = tpu.matmul %136, %137, %cst_51 {dimension_numbers = #tpu.dot_dimension_numbers<[1], [0], [0], [1], [0, 0, 1, 1], [], []>} : vector<16x32xf32>, vector<32x64xf32>, vector<16x64xf32> -> vector<16x64xf32>
    %c0_52 = arith.constant 0 : index
    %c0_53 = arith.constant 0 : index
    %139 = vector.load %arg11[%c0_52, %c0_53] : memref<1x64xf32, #tpu.memory_space<vmem>>, vector<1x64xf32>
    %140 = vector.broadcast %139 : vector<1x64xf32> to vector<16x64xf32>
    %141 = arith.addf %138, %140 : vector<16x64xf32>
    %cst_54 = arith.constant 0.000000e+00 : f32
    %142 = vector.broadcast %cst_54 : f32 to vector<16x64xf32>
    %143 = arith.maximumf %141, %142 : vector<16x64xf32>
    %c0_55 = arith.constant 0 : index
    %c0_56 = arith.constant 0 : index
    %144 = vector.load %arg12[%c0_55, %c0_56] : memref<64x32xf32, #tpu.memory_space<vmem>>, vector<64x32xf32>
    %cst_57 = arith.constant dense<0.000000e+00> : vector<16x32xf32>
    %145 = tpu.matmul %143, %144, %cst_57 {dimension_numbers = #tpu.dot_dimension_numbers<[1], [0], [0], [1], [0, 0, 1, 1], [], []>} : vector<16x64xf32>, vector<64x32xf32>, vector<16x32xf32> -> vector<16x32xf32>
    %c0_58 = arith.constant 0 : index
    %c0_59 = arith.constant 0 : index
    %146 = vector.load %arg13[%c0_58, %c0_59] : memref<1x32xf32, #tpu.memory_space<vmem>>, vector<1x32xf32>
    %147 = vector.broadcast %146 : vector<1x32xf32> to vector<16x32xf32>
    %148 = arith.addf %145, %147 : vector<16x32xf32>
    %149 = arith.addf %111, %148 : vector<16x32xf32>
    %c0_60 = arith.constant 0 : index
    %c0_61 = arith.constant 0 : index
    %150 = vector.load %arg14[%c0_60, %c0_61] : memref<16x32xf32, #tpu.memory_space<vmem>>, vector<16x32xf32>
    tpu.vector_store %arg14[%c0_60, %c0_61], %149 {strides = array<i32>} : memref<16x32xf32, #tpu.memory_space<vmem>>, vector<16x32xf32>,
    return
  }
}

</mosaic_0001>

<bundles_post_ra>
// kernel: encoder_layer_pallas.1
= control target key start
LH: loop header
LB: loop body
LE: loop exit
PB: predicated region body
PF: predicated region fallthrough
CT: control target
= control target key end

     0   :  { %19 = vsyncpa [#allocation3], 0  ;;  %s2508_s0 = inlined_call_operand.vmem [shape: f32[16,32], index: 0, kind: input, shape index: {}]   ;;  %s2509_s1 = inlined_call_operand.vmem [shape: f32[16,16], index: 1, kind: input, shape index: {}]   ;;  %s2510_s2 = inlined_call_operand.vmem [shape: f32[1,32], index: 2, kind: input, shape index: {}]   ;;  %s2511_s3 = inlined_call_operand.hbm [shape: f32[1,32], index: 3, kind: input, shape index: {}]   ;;  %s2512_s4 = inlined_call_operand.vmem [shape: f32[32,96], index: 4, kind: input, shape index: {}]   ;;  %s2513_s5 = inlined_call_operand.hbm [shape: f32[1,96], index: 5, kind: input, shape index: {}]   ;;  %s2514_s6 = inlined_call_operand.vmem [shape: f32[32,32], index: 6, kind: input, shape index: {}]   ;;  %s2515_s7 = inlined_call_operand.hbm [shape: f32[1,32], index: 7, kind: input, shape index: {}]   ;;  %s2516_s8 = inlined_call_operand.hbm [shape: f32[1,32], index: 8, kind: input, shape index: {}]   ;;  %s2517_s9 = inlined_call_operand.hbm [shape: f32[1,32], index: 9, kind: input, shape index: {}]   ;;  %s2518_s10 = inlined_call_operand.vmem [shape: f32[32,64], index: 10, kind: input, shape index: {}]   ;;  %s2519_s11 = inlined_call_operand.hbm [shape: f32[1,64], index: 11, kind: input, shape index: {}]   ;;  %s2520_s12 = inlined_call_operand.vmem [shape: f32[64,32], index: 12, kind: input, shape index: {}]   ;;  %s2521_s13 = inlined_call_operand.hbm [shape: f32[1,32], index: 13, kind: input, shape index: {}]   ;;  %s2522_s14 = inlined_call_operand.hbm [shape: f32[16,32], index: 14, kind: output, shape index: {}]  }
   0x1   :  { %20 = vsyncpa [#allocation6], 0 }
   0x2   :  { %21 = vsyncpa [#allocation9], 0 }
   0x3   :  { %22 = vsyncpa [#allocation12], 0 }
   0x4   :  { %23 = vsyncpa [#allocation4], 0  ;;  %s2171_s29 = smov [#allocation5]   ;;  %s2172_s15 = smov [#allocation8]  }
   0x5   :  { %s48_s30 = sshll.u32 %s2171_s29, 4  ;;  %s70_s16 = sshll.u32 %s2172_s15, 4  ;;  %s49_s30 = int_to_ptr.vmem [resolvable:$true] %s48_s30  ;;  %s71_s16 = int_to_ptr.vmem [resolvable:$true] %s70_s16 }
   0x6   :  { %s2009_s17 = scalar_lea.vmem %s49_s30, 16  ;;  %s2013_s18 = scalar_lea.vmem %s49_s30, 32 }
   0x7   :  { %p2010_p0 = scmp.ne.s32.totalorder %s49_s30, %s2009_s17  ;;  %p2014_p1 = scmp.lt.s32.totalorder %s49_s30, %s49_s30 }
   0x8   :  { %p2015_p2 = scmp.lt.s32.totalorder %s2013_s18, %s2009_s17 }
   0xa   :  { %p2016_p3 = por %p2015_p2, %p2014_p1 }
   0xc   :  { %p2017_p4 = pnand %p2016_p3, %p2010_p0 }
   0xe   :  { %2020 = shalt.err (!%p2017_p4)
}
   0xf   :  { %51 = dma.hbm_to_vmem [thread:$0]  %s2513_s5, 16, %s49_s30, [#allocation6]  }
  0x10   :  { %s2029_s21 = scalar_lea.vmem %s71_s16, 16  ;;  %s2033_s22 = scalar_lea.vmem %s71_s16, 32 }
  0x11   :  { %p2030_p5 = scmp.ne.s32.totalorder %s71_s16, %s2029_s21  ;;  %p2034_p6 = scmp.lt.s32.totalorder %s71_s16, %s71_s16 }
  0x12   :  { %p2035_p7 = scmp.lt.s32.totalorder %s2033_s22, %s2029_s21 }
  0x14   :  { %p2036_p8 = por %p2035_p7, %p2034_p6 }
  0x16   :  { %p2037_p9 = pnand %p2036_p8, %p2030_p5 }
  0x18   :  { %2040 = shalt.err (!%p2037_p9)
}
  0x19   :  { %73 = dma.hbm_to_vmem [thread:$0]  %s2516_s8, 16, %s71_s16, [#allocation9]  }
  0x1a   :  { %s2173_s25 = smov [#allocation11]   ;;  %s2174_s27 = smov [#allocation2]  }
  0x1b   :  { %s92_s26 = sshll.u32 %s2173_s25, 4  ;;  %s36_s28 = sshll.u32 %s2174_s27, 4  ;;  %s93_s26 = int_to_ptr.vmem [resolvable:$true] %s92_s26  ;;  %s37_s28 = int_to_ptr.vmem [resolvable:$true] %s36_s28 }
  0x1c   :  { %s2049_s29 = scalar_lea.vmem %s93_s26, 16  ;;  %s2053_s5 = scalar_lea.vmem %s93_s26, 32 }
  0x1d   :  { %p2050_p10 = scmp.ne.s32.totalorder %s93_s26, %s2049_s29  ;;  %p2054_p11 = scmp.lt.s32.totalorder %s93_s26, %s93_s26 }
  0x1e   :  { %p2055_p12 = scmp.lt.s32.totalorder %s2053_s5, %s2049_s29 }
  0x20   :  { %p2056_p13 = por %p2055_p12, %p2054_p11 }
  0x22   :  { %p2057_p0 = pnand %p2056_p13, %p2050_p10 }
  0x24   :  { %2060 = shalt.err (!%p2057_p0)
}
  0x25   :  { %95 = dma.hbm_to_vmem [thread:$0]  %s2519_s11, 16, %s93_s26, [#allocation12]  }
  0x26   :  { %s2069_s17 = scalar_lea.vmem %s37_s28, 16  ;;  %s2073_s8 = scalar_lea.vmem %s37_s28, 32 }
  0x27   :  { %p2070_p1 = scmp.ne.s32.totalorder %s37_s28, %s2069_s17  ;;  %p2074_p2 = scmp.lt.s32.totalorder %s37_s28, %s37_s28 }
  0x28   :  { %p2075_p3 = scmp.lt.s32.totalorder %s2073_s8, %s2069_s17 }
  0x2a   :  { %p2076_p4 = por %p2075_p3, %p2074_p2 }
  0x2c   :  { %p2077_p5 = pnand %p2076_p4, %p2070_p1 }
  0x2e   :  { %2080 = shalt.err (!%p2077_p5)
}
  0x2f   :  { %39 = dma.hbm_to_vmem [thread:$0]  %s2511_s3, 16, %s37_s28, [#allocation3]  }
  0x30   :  { %s2175_s19 = smov [#allocation7]   ;;  %s2176_s21 = smov [#allocation10]  }
  0x31   :  { %s60_s20 = sshll.u32 %s2175_s19, 4  ;;  %s80_s22 = sshll.u32 %s2176_s21, 4  ;;  %s61_s20 = int_to_ptr.vmem [resolvable:$true] %s60_s20  ;;  %s81_s22 = int_to_ptr.vmem [resolvable:$true] %s80_s22 }
  0x32   :  { %s2089_s23 = scalar_lea.vmem %s61_s20, 16  ;;  %s2093_s11 = scalar_lea.vmem %s61_s20, 32 }
  0x33   :  { %p2090_p6 = scmp.ne.s32.totalorder %s61_s20, %s2089_s23  ;;  %p2094_p7 = scmp.lt.s32.totalorder %s61_s20, %s61_s20 }
  0x34   :  { %p2095_p8 = scmp.lt.s32.totalorder %s2093_s11, %s2089_s23 }
  0x36   :  { %p2096_p9 = por %p2095_p8, %p2094_p7 }
  0x38   :  { %p2097_p10 = pnand %p2096_p9, %p2090_p6 }
  0x3a   :  { %2100 = shalt.err (!%p2097_p10)
}
  0x3b   :  { %63 = dma.hbm_to_vmem [thread:$0]  %s2515_s7, 16, %s61_s20, [#allocation6]  }
  0x3c   :  { %s2109_s26 = scalar_lea.vmem %s81_s22, 16  ;;  %s2113_s3 = scalar_lea.vmem %s81_s22, 32 }
  0x3d   :  { %p2110_p11 = scmp.ne.s32.totalorder %s81_s22, %s2109_s26  ;;  %p2114_p12 = scmp.lt.s32.totalorder %s81_s22, %s81_s22 }
  0x3e   :  { %p2115_p13 = scmp.lt.s32.totalorder %s2113_s3, %s2109_s26 }
  0x40   :  { %p2116_p0 = por %p2115_p13, %p2114_p12 }
  0x42   :  { %p2117_p1 = pnand %p2116_p0, %p2110_p11 }
  0x44   :  { %2120 = shalt.err (!%p2117_p1)
}
  0x45   :  { %83 = dma.hbm_to_vmem [thread:$0]  %s2517_s9, 16, %s81_s22, [#allocation9]  }
  0x46   :  { %s2177_s29 = smov [#allocation13]  }
  0x47   :  { %s104_s5 = sshll.u32 %s2177_s29, 4  ;;  %s105_s5 = int_to_ptr.vmem [resolvable:$true] %s104_s5 }
  0x48   :  { %s2129_s30 = scalar_lea.vmem %s105_s5, 16  ;;  %s2133_s15 = scalar_lea.vmem %s105_s5, 32 }
  0x49   :  { %p2130_p2 = scmp.ne.s32.totalorder %s105_s5, %s2129_s30  ;;  %p2134_p3 = scmp.lt.s32.totalorder %s105_s5, %s105_s5 }
  0x4a   :  { %p2135_p4 = scmp.lt.s32.totalorder %s2133_s15, %s2129_s30 }
  0x4c   :  { %p2136_p5 = por %p2135_p4, %p2134_p3 }
  0x4e   :  { %p2137_p6 = pnand %p2136_p5, %p2130_p2 }
  0x50   :  { %2140 = shalt.err (!%p2137_p6)
}
  0x51   :  { %107 = dma.hbm_to_vmem [thread:$0]  %s2521_s13, 16, %s105_s5, [#allocation12]  }
  0x52   :  { %2161 = dma.done.wait [#allocation3], 16  }
  0x53   :  { %2162 = vsyncadd [#allocation3], 4294967280 }
  0x54   :  { %2163 = dma.done.wait [#allocation6], 32  }
  0x55   :  { %2164 = vsyncadd [#allocation6], 4294967264 }
  0x56   :  { %2165 = dma.done.wait [#allocation9], 32  }
  0x57   :  { %2166 = vsyncadd [#allocation9], 4294967264 }
  0x58   :  { %2167 = dma.done.wait [#allocation12], 32  }
  0x59   :  { %2168 = vsyncadd [#allocation12], 4294967264  ;;  %vm135_vm0 = vcmask 261120   ;;  %v2291_v0 = vld [vmem:[%s2508_s0] sm:$0xff]  ;;  %v2296_v1 = vld [vmem:[%s2508_s0 + $0x8] sm:$0xff]  ;;  %vm304_vm5 = vcmask 64512  }
  0x5a   :  { %v136_v2 = vsel %vm135_vm0, %v2291_v0, 0.0  ;;  %v139_v3 = vsel %vm135_vm0, %v2296_v1, 0.0  ;;  %v196_v14 = vld [vmem:[%s2512_s4 + $0x18] sm:$0xff]  ;;  %v195_v15 = vld [vmem:[%s2512_s4 + $0x10] sm:$0xff]  ;;  %v194_v16 = vld [vmem:[%s2512_s4 + $0x8] sm:$0xff]  ;;  %vm388_vm6 = vcmask 130048  }
  0x5b   :  { %137 = vadd.xlane.f32.xlu0 %v136_v2  ;;  %1815 = vmatprep.subr.mxu0 %v196_v14  ;;  %v193_v17 = vld [vmem:[%s2512_s4] sm:$0xff]  ;;  %v2340_v51 = vld [vmem:[%s2509_s1 + $0x8] sm:$0xff]  ;;  %s2180_s28 = smov 88   ;;  %s2181_s29 = smov 120   ;;  %vm1597_vm11 = vcmask 523264  }
  0x5c   :  { %1816 = vmatpush3.msra.mxu0 %v196_v14  ;;  %v1703_v34 = vld [vmem:[%s2510_s2] ss:$0 sm:$0xff]  ;;  %v1705_v44 = vld [vmem:[#allocation5] ss:$0 sm:$0xff]  ;;  %s2178_s2 = smov 96   ;;  %s2182_s5 = smov 80  }
  0x5d   :  { %1817 = vmatprep.subr.mxu0 %v195_v15  ;;  %v1704_v37 = vld [vmem:[#allocation2] ss:$0 sm:$0xff]  ;;  %s2183_s30 = smov 112   ;;  %s2184_s17 = smov 56  }
  0x5e   :  { %1818 = vmatpush3.msra.mxu0 %v195_v15  ;;  %v2345_v53 = vld [vmem:[%s2509_s1] sm:$0xff]  ;;  %s2179_s1 = smov 64   ;;  %s2185_s9 = smov 72  }
  0x5f   :  { %140 = vadd.xlane.f32.xlu0 %v139_v3  ;;  %1819 = vmatprep.subr.mxu0 %v194_v16  ;;  %s2186_s8 = smov 104   ;;  %s2187_s16 = smov 48  }
  0x60   :  { %1820 = vmatpush3.msra.mxu0 %v194_v16  ;;  %s2188_s20 = smov 40   ;;  %s2189_s13 = smov [#allocation14]  }
  0x61   :  { %1821 = vmatprep.subr.mxu0 %v193_v17  ;;  %s1688_s19 = sshll.u32 %s2189_s13, 4  ;;  %s1689_s19 = int_to_ptr.vmem [resolvable:$true] %s1688_s19 }
  0x62   :  { %1822 = vmatpush3.msra.mxu0 %v193_v17  ;;  %p2146_p8 = scmp.lt.s32.totalorder %s1689_s19, %s1689_s19 }
  0xe4   :  { %v138_v4 = vpop.xlane.xlu0 %137 }
  0xe5   :  { %v143_v5 = vmul.f32 0.03125, %v138_v4 }
  0xe7   :  { %v145_v6 = vsub.f32 %v2291_v0, %v143_v5 }
  0xe8   :  { %v141_v7 = vpop.xlane.xlu0 %140 }
  0xe9   :  { %v144_v8 = vmul.f32 0.03125, %v141_v7  ;;  %v147_v9 = vmul.f32 %v145_v6, %v145_v6  ;;  %v181_v35 = vmul.f32 %v1703_v34, %v145_v6 }
  0xeb   :  { %v146_v10 = vsub.f32 %v2296_v1, %v144_v8  ;;  %v149_v11 = vsel %vm135_vm0, %v147_v9, 0.0 }
  0xec   :  { %150 = vadd.xlane.f32.xlu1 %v149_v11  ;;  %v285_v11 = vld [vmem:[%s2514_s6] sm:$0xff] }
  0xed   :  { %v148_v12 = vmul.f32 %v146_v10, %v146_v10  ;;  %v182_v39 = vmul.f32 %v1703_v34, %v146_v10 }
  0xef   :  { %v152_v13 = vsel %vm135_vm0, %v148_v12, 0.0 }
  0xf0   :  { %153 = vadd.xlane.f32.xlu1 %v152_v13 }
 0x175   :  { %v151_v18 = vpop.xlane.xlu1 %150 }
 0x176   :  { %v155_v19 = vmul.f32 0.032258064, %v151_v18 }
 0x178   :  { %1953 = vrsqrt.f32 %v155_v19  ;;  %vm159_vm1 = vcmp.eq.f32.partialorder %v155_v19, inf  ;;  %v162_v24 = vand.u32 2147483648, %v155_v19  ;;  %vm161_vm2 = vcmp.eq.f32.partialorder %v155_v19, 0.0 }
 0x179   :  { %v154_v20 = vpop.xlane.xlu1 %153 }
 0x17a   :  { %v156_v21 = vmul.f32 0.032258064, %v154_v20 }
 0x17c   :  { %1955 = vrsqrt.f32 %v156_v21  ;;  %vm166_vm3 = vcmp.eq.f32.partialorder %v156_v21, inf  ;;  %v169_v30 = vand.u32 2147483648, %v156_v21  ;;  %vm168_vm4 = vcmp.eq.f32.partialorder %v156_v21, 0.0 }
 0x185   :  { %v1954_v22 = vpop.eup %1953 }
 0x186   :  { %v158_v23 = vmul.f32 %v1954_v22, %v155_v19 }
 0x188   :  { %v160_v25 = vsel %vm159_vm1, %v155_v19, %v158_v23 }
 0x189   :  { %v1956_v26 = vpop.eup %1955  ;;  %v163_v27 = vsel %vm161_vm2, %v162_v24, %v160_v25 }
 0x18a   :  { %v165_v28 = vmul.f32 %v1956_v26, %v156_v21  ;;  %v171_v29 = vadd.f32 1e-06, %v163_v27 }
 0x18c   :  { %v167_v31 = vsel %vm166_vm3, %v156_v21, %v165_v28  ;;  %1957 = vrcp.f32 %v171_v29 }
 0x18d   :  { %v170_v32 = vsel %vm168_vm4, %v169_v30, %v167_v31 }
 0x18e   :  { %v172_v33 = vadd.f32 1e-06, %v170_v32 }
 0x190   :  { %1959 = vrcp.f32 %v172_v33 }
 0x199   :  { %v1958_v36 = vpop.eup %1957 }
 0x19a   :  { %v183_v38 = vmul.f32 %v1958_v36, %v181_v35 }
 0x19c   :  { %v191_v40 = vadd.f32 %v1704_v37, %v183_v38 }
 0x19d   :  { %v1960_v41 = vpop.eup %1959 }
 0x19e   :  { %v184_v42 = vmul.f32 %v1960_v41, %v182_v39  ;;  %1823 = vmatprep.mubr.msk.f32.mxu0 %vm135_vm0, %v191_v40 }
 0x1a0   :  { %v192_v43 = vadd.f32 %v1704_v37, %v184_v42 }
 0x1a2   :  { %1824 = vmatmul.mubr.msk.f32.vlgmr.msra.gmra.mxu0 %vm135_vm0, %v192_v43 }
 0x262   :  { %v1825_v45 = vpop.f32.mrf.mxu0 }
 0x263   :  { %v2323_v46 = vadd.f32 %v1825_v45, %v1705_v44 }
 0x264   :  { %v276_v47 = vpop.f32.mrf.mxu0 }
 0x265   :  { %v2325_v48 = vadd.f32 %v1705_v44, %v276_v47  ;;  %302 = vrot.lane.b32.xlu0 %v2323_v46, %s2178_s2 }
 0x267   :  { %300 = vrot.lane.b32.xlu1 %v2325_v48, %s2178_s2  ;;  %1830 = vmatprep.mubr.msk.f32.mxu1 %vm304_vm5, %v2325_v48 }
 0x2d7   :  { %v303_v49 = vpop.permute.xlu0 %302 }
 0x2d8   :  { %1826 = vmatprep.subr.msk.mxu1 %vm304_vm5, %v303_v49 }
 0x2d9   :  { %1827 = vmatpush3.xpose.msk.msra.mxu1 %vm304_vm5, %v303_v49  ;;  %v301_v50 = vpop.permute.xlu1 %300 }
 0x2da   :  { %1828 = vmatprep.subr.msk.mxu1 %vm304_vm5, %v301_v50 }
 0x2dd   :  { %1829 = vmatpush3.xpose.msk.msra.mxu1 %vm304_vm5, %v301_v50 }
 0x2e0   :  { %1831 = vmatmul.mubr.msk.f32.vlgmr.msra.gmra.mxu1 %vm304_vm5, %v2323_v46 }
 0x3a0   :  { %v1832_v52 = vpop.f32.mrf.mxu1 }
 0x3a1   :  { %v385_v54 = vadd.f32 %v1832_v52, %v2340_v51 }
 0x3a2   :  { %v379_v55 = vpop.f32.mrf.mxu1 }
 0x3a3   :  { %v380_v56 = vadd.f32 %v379_v55, %v2345_v53  ;;  %v392_v57 = vsel %vm388_vm6, %v385_v54, -inf }
 0x3a4   :  { %393 = vmax.xlane.f32.xlu0 %v392_v57 }
 0x3a5   :  { %v389_v58 = vsel %vm388_vm6, %v380_v56, -inf }
 0x3a6   :  { %390 = vmax.xlane.f32.xlu1 %v389_v58 }
 0x42d   :  { %v394_v59 = vpop.xlane.xlu0 %393 }
 0x42e   :  { %v396_v60 = vsub.f32 %v385_v54, %v394_v59 }
 0x42f   :  { %v391_v61 = vpop.xlane.xlu1 %390 }
 0x430   :  { %v399_v62 = vmul.f32 1.442695, %v396_v60  ;;  %v395_v63 = vsub.f32 %v380_v56, %v391_v61 }
 0x432   :  { %1961 = vpow2.f32 %v399_v62  ;;  %v397_v2 = vmul.f32 1.442695, %v395_v63 }
 0x434   :  { %1963 = vpow2.f32 %v397_v2 }
 0x43f   :  { %v1962_v3 = vpop.eup %1961 }
 0x440   :  { %v404_v4 = vsel %vm388_vm6, %v1962_v3, 0.0 }
 0x441   :  { %v1964_v5 = vpop.eup %1963  ;;  %405 = vadd.xlane.f32.xlu1 %v404_v4 }
 0x442   :  { %v401_v6 = vsel %vm388_vm6, %v1964_v5, 0.0 }
 0x443   :  { %402 = vadd.xlane.f32.xlu0 %v401_v6 }
 0x452   :  { %411 = vrot.lane.b32.xlu1 %v2325_v48, %s2179_s1 }
 0x456   :  { %587 = vrot.lane.b32.xlu1 %v2323_v46, %s2180_s28 }
 0x459   :  { %413 = vrot.lane.b32.xlu0 %v2323_v46, %s2179_s1 }
 0x45a   :  { %585 = vrot.lane.b32.xlu1 %v2325_v48, %s2180_s28 }
 0x45d   :  { %581 = vrot.lane.b32.xlu0 %v2325_v48, %s2181_s29 }
 0x45e   :  { %583 = vrot.lane.b32.xlu1 %v2323_v46, %s2181_s29 }
 0x461   :  { %870 = vrot.lane.b32.xlu0 %v2323_v46, %s2182_s5 }
 0x462   :  { %868 = vrot.lane.b32.xlu1 %v2325_v48, %s2182_s5 }
 0x465   :  { %864 = vrot.lane.b32.xlu0 %v2325_v48, %s2183_s30 }
 0x466   :  { %866 = vrot.lane.b32.xlu1 %v2323_v46, %s2183_s30 }
 0x4ca   :  { %v406_v7 = vpop.xlane.xlu1 %405 }
 0x4cb   :  { %1965 = vrcp.f32 %v406_v7 }
 0x4cc   :  { %v403_v8 = vpop.xlane.xlu0 %402 }
 0x4cd   :  { %1967 = vrcp.f32 %v403_v8 }
 0x4ce   :  { %v412_v10 = vpop.permute.xlu1 %411 }
 0x4d0   :  { %v414_v9 = vpop.permute.xlu0 %413 }
 0x4d1   :  { %1833 = vmatprep.subr.mxu0 %v414_v9 }
 0x4d2   :  { %1834 = vmatpush3.msra.mxu0 %v414_v9  ;;  %v588_v16 = vpop.permute.xlu1 %587 }
 0x4d3   :  { %1835 = vmatprep.subr.mxu0 %v412_v10 }
 0x4d4   :  { %1836 = vmatpush3.msra.mxu0 %v412_v10  ;;  %v582_v17 = vpop.permute.xlu0 %581 }
 0x4d5   :  { %1840 = vmatprep.subr.mxu0 %v285_v11 }
 0x4d6   :  { %v586_v19 = vpop.permute.xlu1 %585 }
 0x4d8   :  { %v1966_v12 = vpop.eup %1965  ;;  %v871_v21 = vpop.permute.xlu0 %870 }
 0x4d9   :  { %v410_v15 = vmul.f32 %v1966_v12, %v1962_v3 }
 0x4da   :  { %v1968_v13 = vpop.eup %1967  ;;  %v584_v22 = vpop.permute.xlu1 %583 }
 0x4db   :  { %v409_v14 = vmul.f32 %v1968_v13, %v1964_v5 }
 0x4dc   :  { %v865_v23 = vpop.permute.xlu0 %864 }
 0x4dd   :  { %1837 = vmatprep.mubr.msk.f32.mxu0 %vm388_vm6, %v409_v14  ;;  %v286_v14 = vld [vmem:[%s2514_s6 + $0x8] sm:$0xff] }
 0x4de   :  { %1838 = vmatmul.mubr.msk.f32.vlgmr.msra.gmra.mxu0 %vm388_vm6, %v410_v15  ;;  %v869_v24 = vpop.permute.xlu1 %868 }
 0x4df   :  { %1841 = vmatpush3.msra.mxu0 %v285_v11 }
 0x4e0   :  { %1845 = vmatprep.subr.msk.mxu0 %vm304_vm5, %v588_v16 }
 0x4e2   :  { %v867_v25 = vpop.permute.xlu1 %866 }
 0x59e   :  { %v1839_v18 = vpop.f32.mrf.mxu0 }
 0x5a0   :  { %v489_v20 = vpop.f32.mrf.mxu0 }
 0x5a1   :  { %1842 = vmatprep.mubr.msk.f32.mxu0 %vm304_vm5, %v489_v20 }
 0x5a2   :  { %1843 = vmatmul.mubr.msk.f32.vlgmr.msra.gmra.mxu0 %vm304_vm5, %v1839_v18 }
 0x5a3   :  { %1846 = vmatpush3.xpose.msk.msra.mxu0 %vm304_vm5, %v588_v16  ;;  %1849 = vmatprep.mubr.msk.f32.mxu0 %vm304_vm5, %v582_v17 }
 0x5a4   :  { %1847 = vmatprep.subr.msk.mxu0 %vm304_vm5, %v586_v19 }
 0x5a7   :  { %1848 = vmatpush3.xpose.msk.msra.mxu0 %vm304_vm5, %v586_v19 }
 0x5a8   :  { %1864 = vmatprep.subr.msk.mxu0 %vm304_vm5, %v871_v21 }
 0x5aa   :  { %1850 = vmatmul.mubr.msk.f32.vlgmr.msra.gmra.mxu0 %vm304_vm5, %v584_v22 }
 0x5ab   :  { %1865 = vmatpush3.xpose.msk.msra.mxu0 %vm304_vm5, %v871_v21  ;;  %1868 = vmatprep.mubr.msk.f32.mxu0 %vm304_vm5, %v865_v23 }
 0x5ac   :  { %1866 = vmatprep.subr.msk.mxu0 %vm304_vm5, %v869_v24 }
 0x5af   :  { %1867 = vmatpush3.xpose.msk.msra.mxu0 %vm304_vm5, %v869_v24 }
 0x5b2   :  { %1869 = vmatmul.mubr.msk.f32.vlgmr.msra.gmra.mxu0 %vm304_vm5, %v867_v25 }
 0x662   :  { %v2382_v26 = vpop.f32.mrf.mxu0 }
 0x664   :  { %v2384_v27 = vpop.f32.mrf.mxu0 }
 0x66a   :  { %v1851_v28 = vpop.f32.mrf.mxu0 }
 0x66b   :  { %v669_v29 = vadd.f32 %v1851_v28, %v2340_v51 }
 0x66c   :  { %v663_v30 = vpop.f32.mrf.mxu0 }
 0x66d   :  { %v664_v31 = vadd.f32 %v663_v30, %v2345_v53  ;;  %v675_v32 = vsel %vm388_vm6, %v669_v29, -inf }
 0x66e   :  { %676 = vmax.xlane.f32.xlu1 %v675_v32 }
 0x66f   :  { %v672_v33 = vsel %vm388_vm6, %v664_v31, -inf }
 0x670   :  { %673 = vmax.xlane.f32.xlu0 %v672_v33 }
 0x672   :  { %v1870_v34 = vpop.f32.mrf.mxu0 }
 0x673   :  { %v952_v35 = vadd.f32 %v1870_v34, %v2340_v51 }
 0x674   :  { %v946_v58 = vpop.f32.mrf.mxu0 }
 0x675   :  { %v958_v36 = vsel %vm388_vm6, %v952_v35, -inf  ;;  %v947_v59 = vadd.f32 %v946_v58, %v2345_v53 }
 0x677   :  { %v955_v60 = vsel %vm388_vm6, %v947_v59, -inf }
 0x67f   :  { %694 = vrot.lane.b32.xlu1 %v2325_v48, %s2184_s17 }
 0x683   :  { %1153 = vrot.lane.b32.xlu1 %v2323_v46, %s2185_s9 }
 0x687   :  { %1151 = vrot.lane.b32.xlu1 %v2325_v48, %s2185_s9 }
 0x68b   :  { %1149 = vrot.lane.b32.xlu1 %v2323_v46, %s2186_s8 }
 0x6af   :  { %959 = vmax.xlane.f32.xlu1 %v958_v36 }
 0x6c0   :  { %977 = vrot.lane.b32.xlu1 %v2325_v48, %s2187_s16 }
 0x6f7   :  { %v677_v37 = vpop.xlane.xlu1 %676 }
 0x6f8   :  { %v679_v38 = vsub.f32 %v669_v29, %v677_v37 }
 0x6f9   :  { %v674_v39 = vpop.xlane.xlu0 %673 }
 0x6fa   :  { %v682_v40 = vmul.f32 1.442695, %v679_v38  ;;  %v678_v41 = vsub.f32 %v664_v31, %v674_v39  ;;  %v287_v31 = vld [vmem:[%s2514_s6 + $0x10] sm:$0xff] }
 0x6fb   :  { %v695_v42 = vpop.permute.xlu1 %694 }
 0x6fc   :  { %1969 = vpow2.f32 %v682_v40  ;;  %v680_v43 = vmul.f32 1.442695, %v678_v41 }
 0x6fe   :  { %1971 = vpow2.f32 %v680_v43 }
 0x6ff   :  { %v1154_v44 = vpop.permute.xlu1 %1153 }
 0x700   :  { %1883 = vmatprep.subr.msk.mxu0 %vm304_vm5, %v1154_v44 }
 0x701   :  { %1884 = vmatpush3.xpose.msk.msra.mxu0 %vm304_vm5, %v1154_v44 }
 0x703   :  { %v1152_v45 = vpop.permute.xlu1 %1151 }
 0x704   :  { %1885 = vmatprep.subr.msk.mxu0 %vm304_vm5, %v1152_v45 }
 0x705   :  { %1886 = vmatpush3.xpose.msk.msra.mxu0 %vm304_vm5, %v1152_v45 }
 0x707   :  { %v1150_v54 = vpop.permute.xlu1 %1149 }
 0x709   :  { %v1970_v47 = vpop.eup %1969 }
 0x70a   :  { %v687_v49 = vsel %vm388_vm6, %v1970_v47, 0.0 }
 0x70b   :  { %v1972_v50 = vpop.eup %1971  ;;  %688 = vadd.xlane.f32.xlu0 %v687_v49 }
 0x70c   :  { %v684_v52 = vsel %vm388_vm6, %v1972_v50, 0.0 }
 0x70f   :  { %685 = vadd.xlane.f32.xlu0 %v684_v52 }
 0x725   :  { %696 = vrot.lane.b32.xlu0 %v2323_v46, %s2184_s17 }
 0x729   :  { %1147 = vrot.lane.b32.xlu0 %v2325_v48, %s2186_s8 }
 0x738   :  { %v960_v55 = vpop.xlane.xlu1 %959 }
 0x739   :  { %v962_v56 = vsub.f32 %v952_v35, %v960_v55 }
 0x73b   :  { %v965_v57 = vmul.f32 1.442695, %v962_v56 }
 0x73c   :  { %v978_v25 = vpop.permute.xlu1 %977 }
 0x73d   :  { %1973 = vpow2.f32 %v965_v57 }
 0x748   :  { %956 = vmax.xlane.f32.xlu0 %v955_v60 }
 0x74a   :  { %v1974_v61 = vpop.eup %1973 }
 0x74b   :  { %v970_v62 = vsel %vm388_vm6, %v1974_v61, 0.0 }
 0x74c   :  { %971 = vadd.xlane.f32.xlu0 %v970_v62 }
 0x794   :  { %v689_v63 = vpop.xlane.xlu0 %688 }
 0x795   :  { %1975 = vrcp.f32 %v689_v63 }
 0x798   :  { %v686_v2 = vpop.xlane.xlu0 %685 }
 0x799   :  { %1977 = vrcp.f32 %v686_v2 }
 0x79c   :  { %v697_v3 = vpop.permute.xlu0 %696 }
 0x79d   :  { %1852 = vmatprep.subr.mxu1 %v697_v3 }
 0x79e   :  { %1853 = vmatpush3.msra.mxu1 %v697_v3 }
 0x79f   :  { %1854 = vmatprep.subr.mxu1 %v695_v42 }
 0x7a0   :  { %v1148_v4 = vpop.permute.xlu0 %1147  ;;  %1855 = vmatpush3.msra.mxu1 %v695_v42  ;;  %v1708_v42 = vld [vmem:[#allocation7] ss:$0 sm:$0xff] }
 0x7a1   :  { %1887 = vmatprep.mubr.msk.f32.mxu0 %vm304_vm5, %v1148_v4  ;;  %1859 = vmatprep.subr.mxu1 %v286_v14  ;;  %v297_v43 = vadd.f32 %v1708_v42, %v2296_v1  ;;  %v296_v44 = vadd.f32 %v1708_v42, %v2291_v0 }
 0x7a2   :  { %1888 = vmatmul.mubr.msk.f32.vlgmr.msra.gmra.mxu0 %vm304_vm5, %v1150_v54  ;;  %v1976_v5 = vpop.eup %1975 }
 0x7a3   :  { %v693_v8 = vmul.f32 %v1976_v5, %v1970_v47  ;;  %v580_v45 = vadd.f32 %v2382_v26, %v297_v43  ;;  %v579_v49 = vadd.f32 %v2384_v27, %v296_v44  ;;  %v288_v26 = vld [vmem:[%s2514_s6 + $0x18] sm:$0xff]  ;;  %v1741_v44 = vld [vmem:[#allocation8] ss:$0 sm:$0xff] }
 0x7a6   :  { %v1978_v6 = vpop.eup %1977 }
 0x7a7   :  { %v692_v7 = vmul.f32 %v1978_v6, %v1972_v50 }
 0x7a9   :  { %1856 = vmatprep.mubr.msk.f32.mxu1 %vm388_vm6, %v692_v7 }
 0x7aa   :  { %1857 = vmatmul.mubr.msk.f32.vlgmr.msra.gmra.mxu1 %vm388_vm6, %v693_v8 }
 0x7ab   :  { %1860 = vmatpush3.msra.mxu1 %v286_v14 }
 0x7d1   :  { %v957_v9 = vpop.xlane.xlu0 %956 }
 0x7d2   :  { %v961_v10 = vsub.f32 %v947_v59, %v957_v9 }
 0x7d4   :  { %v963_v11 = vmul.f32 1.442695, %v961_v10 }
 0x7d5   :  { %v972_v21 = vpop.xlane.xlu0 %971 }
 0x7d6   :  { %1979 = vpow2.f32 %v963_v11 }
 0x7d7   :  { %1981 = vrcp.f32 %v972_v21  ;;  %v1490_v21 = vld [vmem:[%s2518_s10 + $0x10] sm:$0xff] }
 0x7e3   :  { %v1980_v12 = vpop.eup %1979 }
 0x7e4   :  { %v967_v13 = vsel %vm388_vm6, %v1980_v12, 0.0 }
 0x7e5   :  { %968 = vadd.xlane.f32.xlu0 %v967_v13 }
 0x7fb   :  { %979 = vrot.lane.b32.xlu0 %v2323_v46, %s2187_s16 }
 0x862   :  { %v1889_v15 = vpop.f32.mrf.mxu0 }
 0x863   :  { %v1235_v16 = vadd.f32 %v1889_v15, %v2340_v51 }
 0x864   :  { %v1229_v17 = vpop.f32.mrf.mxu0 }
 0x865   :  { %v1230_v18 = vadd.f32 %v1229_v17, %v2345_v53  ;;  %v1241_v19 = vsel %vm388_vm6, %v1235_v16, -inf  ;;  %v1982_v53 = vpop.eup %1981 }
 0x866   :  { %1242 = vmax.xlane.f32.xlu0 %v1241_v19  ;;  %v976_v30 = vmul.f32 %v1982_v53, %v1974_v61  ;;  %v1586_v53 = vld [vmem:[%s2520_s12 + $0x20] sm:$0xff] }
 0x867   :  { %v1238_v20 = vsel %vm388_vm6, %v1230_v18, -inf }
 0x868   :  { %1239 = vmax.xlane.f32.xlu1 %v1238_v20  ;;  %v1491_v20 = vld [vmem:[%s2518_s10 + $0x18] sm:$0xff] }
 0x869   :  { %1902 = vmatprep.subr.mxu0 %v1491_v20 }
 0x86a   :  { %v1858_v22 = vpop.f32.mrf.mxu1  ;;  %1903 = vmatpush3.msra.mxu0 %v1491_v20 }
 0x86b   :  { %1904 = vmatprep.subr.mxu0 %v1490_v21 }
 0x86c   :  { %v772_v23 = vpop.f32.mrf.mxu1  ;;  %1905 = vmatpush3.msra.mxu0 %v1490_v21 }
 0x86d   :  { %1861 = vmatprep.mubr.msk.f32.mxu1 %vm304_vm5, %v772_v23  ;;  %v1488_v23 = vld [vmem:[%s2518_s10] sm:$0xff] }
 0x86e   :  { %1862 = vmatmul.mubr.msk.f32.vlgmr.msra.gmra.mxu1 %vm304_vm5, %v1858_v22  ;;  %v969_v24 = vpop.xlane.xlu0 %968  ;;  %v1489_v22 = vld [vmem:[%s2518_s10 + $0x8] sm:$0xff] }
 0x86f   :  { %1983 = vrcp.f32 %v969_v24  ;;  %1906 = vmatprep.subr.mxu0 %v1489_v22  ;;  %v1589_v24 = vld [vmem:[%s2520_s12 + $0x38] sm:$0xff] }
 0x870   :  { %1907 = vmatpush3.msra.mxu0 %v1489_v22 }
 0x871   :  { %1908 = vmatprep.subr.mxu0 %v1488_v23 }
 0x872   :  { %v980_v51 = vpop.permute.xlu0 %979  ;;  %1909 = vmatpush3.msra.mxu0 %v1488_v23 }
 0x873   :  { %1871 = vmatprep.subr.mxu1 %v980_v51 }
 0x874   :  { %1872 = vmatpush3.msra.mxu1 %v980_v51  ;;  %v1588_v51 = vld [vmem:[%s2520_s12 + $0x30] sm:$0xff] }
 0x875   :  { %1873 = vmatprep.subr.mxu1 %v978_v25 }
 0x876   :  { %1874 = vmatpush3.msra.mxu1 %v978_v25  ;;  %v1587_v25 = vld [vmem:[%s2520_s12 + $0x28] sm:$0xff] }
 0x877   :  { %1878 = vmatprep.subr.mxu1 %v287_v31 }
 0x87c   :  { %v1984_v28 = vpop.eup %1983 }
 0x87d   :  { %v975_v29 = vmul.f32 %v1984_v28, %v1980_v12 }
 0x87f   :  { %1875 = vmatprep.mubr.msk.f32.mxu1 %vm388_vm6, %v975_v29 }
 0x880   :  { %1876 = vmatmul.mubr.msk.f32.vlgmr.msra.gmra.mxu1 %vm388_vm6, %v976_v30 }
 0x881   :  { %1879 = vmatpush3.msra.mxu1 %v287_v31 }
 0x8ef   :  { %v1243_v32 = vpop.xlane.xlu0 %1242 }
 0x8f0   :  { %v1245_v33 = vsub.f32 %v1235_v16, %v1243_v32 }
 0x8f1   :  { %v1240_v34 = vpop.xlane.xlu1 %1239 }
 0x8f2   :  { %v1248_v35 = vmul.f32 1.442695, %v1245_v33  ;;  %v1244_v36 = vsub.f32 %v1230_v18, %v1240_v34 }
 0x8f4   :  { %1985 = vpow2.f32 %v1248_v35  ;;  %v1246_v37 = vmul.f32 1.442695, %v1244_v36 }
 0x8f6   :  { %1987 = vpow2.f32 %v1246_v37 }
 0x901   :  { %v1986_v38 = vpop.eup %1985 }
 0x902   :  { %v1253_v39 = vsel %vm388_vm6, %v1986_v38, 0.0 }
 0x903   :  { %v1988_v40 = vpop.eup %1987  ;;  %1254 = vadd.xlane.f32.xlu1 %v1253_v39 }
 0x904   :  { %v1250_v41 = vsel %vm388_vm6, %v1988_v40, 0.0 }
 0x905   :  { %1251 = vadd.xlane.f32.xlu0 %v1250_v41 }
 0x914   :  { %1260 = vrot.lane.b32.xlu1 %v2325_v48, %s2188_s20 }
 0x91b   :  { %1262 = vrot.lane.b32.xlu0 %v2323_v46, %s2188_s20 }
 0x92e   :  { %v1863_v47 = vpop.f32.mrf.mxu1 }
 0x92f   :  { %v863_v50 = vadd.f32 %v1863_v47, %v580_v45 }
 0x930   :  { %v853_v52 = vpop.f32.mrf.mxu1 }
 0x931   :  { %v862_v54 = vadd.f32 %v853_v52, %v579_v49 }
 0x940   :  { %v1877_v55 = vpop.f32.mrf.mxu1 }
 0x942   :  { %v1055_v56 = vpop.f32.mrf.mxu1 }
 0x943   :  { %1880 = vmatprep.mubr.msk.f32.mxu1 %vm304_vm5, %v1055_v56 }
 0x944   :  { %1881 = vmatmul.mubr.msk.f32.vlgmr.msra.gmra.mxu1 %vm304_vm5, %v1877_v55 }
 0x98c   :  { %v1255_v46 = vpop.xlane.xlu1 %1254 }
 0x98d   :  { %1989 = vrcp.f32 %v1255_v46 }
 0x98e   :  { %v1252_v48 = vpop.xlane.xlu0 %1251 }
 0x98f   :  { %1991 = vrcp.f32 %v1252_v48  ;;  %v1585_v48 = vld [vmem:[%s2520_s12 + $0x18] sm:$0xff] }
 0x990   :  { %v1261_v0 = vpop.permute.xlu1 %1260 }
 0x992   :  { %v1263_v1 = vpop.permute.xlu0 %1262 }
 0x993   :  { %1890 = vmatprep.subr.mxu1 %v1263_v1 }
 0x994   :  { %1891 = vmatpush3.msra.mxu1 %v1263_v1  ;;  %v1584_v1 = vld [vmem:[%s2520_s12 + $0x10] sm:$0xff] }
 0x995   :  { %1892 = vmatprep.subr.mxu1 %v1261_v0 }
 0x996   :  { %1893 = vmatpush3.msra.mxu1 %v1261_v0  ;;  %v1583_v0 = vld [vmem:[%s2520_s12 + $0x8] sm:$0xff] }
 0x997   :  { %1897 = vmatprep.subr.mxu1 %v288_v26 }
 0x99a   :  { %v1990_v27 = vpop.eup %1989 }
 0x99b   :  { %v1259_v59 = vmul.f32 %v1990_v27, %v1986_v38  ;;  %v1743_v27 = vld [vmem:[#allocation11] ss:$0 sm:$0xff] }
 0x99c   :  { %v1992_v57 = vpop.eup %1991 }
 0x99d   :  { %v1258_v58 = vmul.f32 %v1992_v57, %v1988_v40 }
 0x99f   :  { %1894 = vmatprep.mubr.msk.f32.mxu1 %vm388_vm6, %v1258_v58 }
 0x9a0   :  { %1895 = vmatmul.mubr.msk.f32.vlgmr.msra.gmra.mxu1 %vm388_vm6, %v1259_v59 }
 0x9a1   :  { %1898 = vmatpush3.msra.mxu1 %v288_v26  ;;  %v1582_v26 = vld [vmem:[%s2520_s12] sm:$0xff]  ;;  %s2141_s12 = scalar_lea.vmem %s1689_s19, 256 }
 0x9a2   :  { %1913 = vmatprep.subr.mxu1 %v1589_v24  ;;  %p2142_p7 = scmp.ne.s32.totalorder %s1689_s19, %s2141_s12  ;;  %p2147_p9 = scmp.lt.s32.totalorder %s2141_s12, %s2141_s12 }
 0x9a4   :  { %p2148_p10 = por %p2147_p9, %p2146_p8 }
 0x9a6   :  { %p2149_p11 = pnand %p2148_p10, %p2142_p7 }
 0xa04   :  { %v1882_v60 = vpop.f32.mrf.mxu1 }
 0xa05   :  { %v1146_v61 = vadd.f32 %v1882_v60, %v863_v50 }
 0xa06   :  { %v1136_v62 = vpop.f32.mrf.mxu1 }
 0xa07   :  { %v1145_v4 = vadd.f32 %v1136_v62, %v862_v54  ;;  %v1742_v54 = vld [vmem:[#allocation10] ss:$0 sm:$0xff] }
 0xa60   :  { %v1896_v63 = vpop.f32.mrf.mxu1 }
 0xa62   :  { %v1338_v2 = vpop.f32.mrf.mxu1 }
 0xa63   :  { %1899 = vmatprep.mubr.msk.f32.mxu1 %vm304_vm5, %v1338_v2 }
 0xa64   :  { %1900 = vmatmul.mubr.msk.f32.vlgmr.msra.gmra.mxu1 %vm304_vm5, %v1896_v63  ;;  %v1746_v63 = vld [vmem:[#allocation13] ss:$0 sm:$0xff] }
 0xa65   :  { %1914 = vmatpush3.msra.mxu1 %v1589_v24 }
 0xa66   :  { %1915 = vmatprep.subr.mxu1 %v1588_v51 }
 0xa67   :  { %1916 = vmatpush3.msra.mxu1 %v1588_v51 }
 0xa68   :  { %1917 = vmatprep.subr.mxu1 %v1587_v25 }
 0xa69   :  { %1918 = vmatpush3.msra.mxu1 %v1587_v25 }
 0xa6a   :  { %1919 = vmatprep.subr.mxu1 %v1586_v53 }
 0xa6b   :  { %1920 = vmatpush3.msra.mxu1 %v1586_v53 }
 0xa6c   :  { %1921 = vmatprep.subr.mxu1 %v1585_v48 }
 0xa6d   :  { %1922 = vmatpush3.msra.mxu1 %v1585_v48 }
 0xa6e   :  { %1923 = vmatprep.subr.mxu1 %v1584_v1 }
 0xa6f   :  { %1924 = vmatpush3.msra.mxu1 %v1584_v1 }
 0xa70   :  { %1925 = vmatprep.subr.mxu1 %v1583_v0 }
 0xa71   :  { %1926 = vmatpush3.msra.mxu1 %v1583_v0 }
 0xa72   :  { %1927 = vmatprep.subr.mxu1 %v1582_v26 }
 0xa73   :  { %1928 = vmatpush3.msra.mxu1 %v1582_v26 }
 0xb24   :  { %v1901_v3 = vpop.f32.mrf.mxu1 }
 0xb25   :  { %v2451_v5 = vadd.f32 %v1901_v3, %v1146_v61 }
 0xb26   :  { %v1419_v6 = vpop.f32.mrf.mxu1 }
 0xb27   :  { %v2453_v7 = vadd.f32 %v1419_v6, %v1145_v4  ;;  %v1435_v8 = vsel %vm135_vm0, %v2451_v5, 0.0 }
 0xb28   :  { %1436 = vadd.xlane.f32.xlu0 %v1435_v8 }
 0xb29   :  { %v1432_v9 = vsel %vm135_vm0, %v2453_v7, 0.0 }
 0xb2a   :  { %1433 = vadd.xlane.f32.xlu1 %v1432_v9 }
 0xbb1   :  { %v1437_v10 = vpop.xlane.xlu0 %1436 }
 0xbb2   :  { %v1439_v11 = vmul.f32 0.03125, %v1437_v10 }
 0xbb3   :  { %v1434_v12 = vpop.xlane.xlu1 %1433 }
 0xbb4   :  { %v1441_v13 = vsub.f32 %v2451_v5, %v1439_v11  ;;  %v1438_v14 = vmul.f32 0.03125, %v1434_v12 }
 0xbb6   :  { %v1440_v15 = vsub.f32 %v2453_v7, %v1438_v14  ;;  %v1443_v16 = vmul.f32 %v1441_v13, %v1441_v13  ;;  %v1477_v47 = vmul.f32 %v1741_v44, %v1441_v13 }
 0xbb8   :  { %v1447_v17 = vsel %vm135_vm0, %v1443_v16, 0.0  ;;  %v1442_v18 = vmul.f32 %v1440_v15, %v1440_v15  ;;  %v1476_v49 = vmul.f32 %v1741_v44, %v1440_v15 }
 0xbb9   :  { %1448 = vadd.xlane.f32.xlu1 %v1447_v17 }
 0xbba   :  { %v1444_v19 = vsel %vm135_vm0, %v1442_v18, 0.0 }
 0xbbb   :  { %1445 = vadd.xlane.f32.xlu0 %v1444_v19 }
 0xc42   :  { %v1449_v28 = vpop.xlane.xlu1 %1448 }
 0xc43   :  { %v1451_v29 = vmul.f32 0.032258064, %v1449_v28 }
 0xc44   :  { %v1446_v30 = vpop.xlane.xlu0 %1445 }
 0xc45   :  { %1993 = vrsqrt.f32 %v1451_v29  ;;  %v1450_v31 = vmul.f32 0.032258064, %v1446_v30  ;;  %vm1461_vm7 = vcmp.eq.f32.partialorder %v1451_v29, inf  ;;  %v1464_v34 = vand.u32 2147483648, %v1451_v29 }
 0xc46   :  { %vm1463_vm8 = vcmp.eq.f32.partialorder %v1451_v29, 0.0 }
 0xc47   :  { %1995 = vrsqrt.f32 %v1450_v31  ;;  %vm1454_vm9 = vcmp.eq.f32.partialorder %v1450_v31, inf  ;;  %v1457_v40 = vand.u32 2147483648, %v1450_v31  ;;  %vm1456_vm10 = vcmp.eq.f32.partialorder %v1450_v31, 0.0 }
 0xc52   :  { %v1994_v32 = vpop.eup %1993 }
 0xc53   :  { %v1460_v33 = vmul.f32 %v1994_v32, %v1451_v29 }
 0xc54   :  { %v1996_v35 = vpop.eup %1995 }
 0xc55   :  { %v1462_v36 = vsel %vm1461_vm7, %v1451_v29, %v1460_v33  ;;  %v1453_v38 = vmul.f32 %v1996_v35, %v1450_v31 }
 0xc56   :  { %v1465_v37 = vsel %vm1463_vm8, %v1464_v34, %v1462_v36 }
 0xc57   :  { %v1467_v39 = vadd.f32 1e-06, %v1465_v37  ;;  %v1455_v41 = vsel %vm1454_vm9, %v1450_v31, %v1453_v38 }
 0xc58   :  { %v1458_v42 = vsel %vm1456_vm10, %v1457_v40, %v1455_v41 }
 0xc59   :  { %1997 = vrcp.f32 %v1467_v39  ;;  %v1466_v43 = vadd.f32 1e-06, %v1458_v42 }
 0xc5b   :  { %1999 = vrcp.f32 %v1466_v43 }
 0xc66   :  { %v1998_v45 = vpop.eup %1997 }
 0xc67   :  { %v1479_v52 = vmul.f32 %v1998_v45, %v1477_v47 }
 0xc68   :  { %v2000_v50 = vpop.eup %1999 }
 0xc69   :  { %v1478_v55 = vmul.f32 %v2000_v50, %v1476_v49  ;;  %v1487_v46 = vadd.f32 %v1742_v54, %v1479_v52 }
 0xc6b   :  { %v1486_v56 = vadd.f32 %v1742_v54, %v1478_v55 }
 0xc6d   :  { %1910 = vmatprep.mubr.msk.f32.mxu0 %vm135_vm0, %v1486_v56 }
 0xc6e   :  { %1911 = vmatmul.mubr.msk.f32.vlgmr.msra.gmra.mxu0 %vm135_vm0, %v1487_v46 }
 0xd2e   :  { %v1912_v57 = vpop.f32.mrf.mxu0 }
 0xd2f   :  { %v1577_v58 = vadd.f32 %v1912_v57, %v1743_v27 }
 0xd30   :  { %v1571_v59 = vpop.f32.mrf.mxu0 }
 0xd31   :  { %v1572_v60 = vadd.f32 %v1743_v27, %v1571_v59  ;;  %v1581_v62 = vmax.f32 %v1577_v58, 0.0 }
 0xd33   :  { %v1580_v61 = vmax.f32 %v1572_v60, 0.0 }
 0xd35   :  { %1929 = vmatprep.mubr.msk.f32.mxu1 %vm1597_vm11, %v1580_v61 }
 0xd36   :  { %1930 = vmatmul.mubr.msk.f32.vlgmr.msra.gmra.mxu1 %vm1597_vm11, %v1581_v62 }
 0xdf6   :  { %v1931_v2 = vpop.f32.mrf.mxu1 }
 0xdf7   :  { %v1676_v3 = vadd.f32 %v1931_v2, %v1746_v63 }
 0xdf8   :  { %v1670_v4 = vpop.f32.mrf.mxu1 }
 0xdf9   :  { %v1680_v6 = vadd.f32 %v1676_v3, %v2451_v5  ;;  %v1671_v8 = vadd.f32 %v1746_v63, %v1670_v4 }
 0xdfb   :  { %1682 = vst.msk [vmem:[#allocation14 + $0x8] sm:$0xff] %vm135_vm0, %v1680_v6  ;;  %v1679_v9 = vadd.f32 %v1671_v8, %v2453_v7 }
 0xdfd   :  { %1681 = vst.msk [vmem:[#allocation14] sm:$0xff] %vm135_vm0, %v1679_v9 }
 0xdfe   :  { %2152 = shalt.err (!%p2149_p11)
}
 0xdff   :  { %s2190_s20 = smov 128   ;;  %s2191_s21 = smov 8  }
 0xe00   :  { %1694 = dma.vmem_to_hbm [thread:$0]  %s1689_s19, 256, %s2522_s14, [#allocation4], %s2190_s20, %s2190_s20, %s2191_s21  }
 0xe01   :  { %2169 = dma.done.wait [#allocation4], 256  }
 0xe02   :  { %2170 = vsyncadd [#allocation4], 4294967040 }
 0xe03   :  { %1698 = vsyncpa [#allocation3], 1 }
 0xe04   :  { %1699 = vsyncpa [#allocation6], 1 }
 0xe05   :  { %1700 = vsyncpa [#allocation9], 1 }
 0xe06   :  { %1701 = vsyncpa [#allocation12], 1 }
 0xe07   :  { %1702 = vsyncpa [#allocation4], 1 }

</bundles_post_ra>
